<compile_context>
chip_gen: v6e
topology: v6e:2x2x1
jax: 0.10.0
libtpu: 0.0.40
codegen_flags: <defaults>
</compile_context>

<pallas_src>
import functools

import jax
import jax.numpy as jnp
import numpy as np
from jax.experimental import pallas as pl
from jax.experimental.pallas import tpu as pltpu


def _round_up(x, m):
    return ((x + m - 1) // m) * m


def _conv2d_kernel(x_ref, w_ref, scale_ref, shift_ref, o_ref, *,
                   KH, KW, stride, TH, W_out, C_in, relu):
    """One grid step = one (batch, output-row-tile).

    x_ref:     (1, TH_in, W_pad, C_in)   halo'd NHWC input row tile (native dtype)
    w_ref:     (KH*KW*C_in, C_out_p)     im2col weights, lane-dense (C_out padded to 128)
    scale_ref: (1, C_out_p)              fused (BN) channel scale (f32)
    shift_ref: (1, C_out_p)              fused bias / BN shift (f32)
    o_ref:     (1, TH*W_out, C_out_p)    lane-dense output slab
    """
    x = x_ref[0]                                       # (TH_in, W_pad, C_in), no up-cast

    # im2col: gather the KH*KW taps once, then a single fused MXU matmul.
    cols = []
    for kh in range(KH):
        for kw in range(KW):
            cols.append(jax.lax.slice(
                x,
                (kh, kw, 0),
                (kh + (TH - 1) * stride + 1,
                 kw + (W_out - 1) * stride + 1,
                 C_in),
                (stride, stride, 1)))                  # (TH, W_out, C_in)
    patch = jnp.concatenate(cols, axis=-1)             # (TH, W_out, KH*KW*C_in)
    patch = patch.reshape(TH * W_out, KH * KW * C_in)  # explicit 2-D (M, K)

    acc = jnp.dot(patch, w_ref[...],
                  preferred_element_type=jnp.float32)  # (M, C_out_p), f32 accumulate

    out = acc * scale_ref[...] + shift_ref[...]
    if relu:
        out = jnp.maximum(out, 0.0)
    o_ref[0] = out.astype(o_ref.dtype)                 # unmasked lane-dense store


def conv2d_forward(x_nchw, weight, bias, *, stride=1, relu=True,
                   same_padding=False, bn=False, bn_params=None, block_h=8):
    """Equivalent of the PyTorch Conv2d module forward.

    x_nchw: (N, C_in, H, W)
    weight: (C_out, C_in, KH, KW)   (PyTorch conv weight layout)
    bias:   (C_out,)
    bn_params: (gamma, beta, running_mean, running_var, eps) if bn=True.
    """
    N, C_in, H, W = x_nchw.shape
    C_out, _, KH, KW = weight.shape
    pad = (KH - 1) // 2 if same_padding else 0
    # TODO(synk): pad=(K-1)//2 matches PyTorch 'same_padding' only for odd kernel sizes.

    H_out = (H + 2 * pad - KH) // stride + 1
    W_out = (W + 2 * pad - KW) // stride + 1
    W_pad = W + 2 * pad

    # output-row tiling (with halo) so the per-step VMEM footprint is bounded
    TH = max(1, min(block_h, H_out))
    T = int(pl.cdiv(H_out, TH))
    H_out_p = T * TH
    TH_in = (TH - 1) * stride + KH
    rows_needed = (H_out_p - 1) * stride + KH
    extra_bottom = max(0, rows_needed - (H + 2 * pad))

    # host-side glue: NCHW -> NHWC, spatial padding, halo row tiles
    # TODO(synk): if this conv is one layer of a network, keep activations in this
    # internal layout across layers instead of transposing per call.
    x = jnp.transpose(x_nchw, (0, 2, 3, 1))
    x = jnp.pad(x, ((0, 0), (pad, pad + extra_bottom), (pad, pad), (0, 0)))
    tiles = jnp.stack(
        [x[:, t * TH * stride: t * TH * stride + TH_in] for t in range(T)],
        axis=1)                                        # (N, T, TH_in, W_pad, C_in)
    tiles = tiles.reshape(N * T, TH_in, W_pad, C_in)

    # lane-dense im2col weights: rows ordered (kh, kw, c_in) to match the kernel
    C_out_p = _round_up(C_out, 128)
    K_dim = KH * KW * C_in
    w2d = jnp.transpose(weight, (2, 3, 1, 0)).reshape(K_dim, C_out)
    w2d = jnp.pad(w2d, ((0, 0), (0, C_out_p - C_out))).astype(x.dtype)

    if bn:
        # TODO(synk): PyTorch BatchNorm2d in .train() uses per-batch statistics;
        # here we fuse the inference-mode (running-stats) normalization.
        gamma, beta, mean, var, eps = bn_params
        s = gamma / jnp.sqrt(var + eps)
        scale = s.astype(jnp.float32)
        shift = ((bias - mean) * s + beta).astype(jnp.float32)
    else:
        scale = jnp.ones((C_out,), jnp.float32)
        shift = bias.astype(jnp.float32)
    scale = jnp.pad(scale, (0, C_out_p - C_out), constant_values=1.0).reshape(1, C_out_p)
    shift = jnp.pad(shift, (0, C_out_p - C_out)).reshape(1, C_out_p)

    kern = functools.partial(_conv2d_kernel, KH=KH, KW=KW, stride=stride,
                             TH=TH, W_out=W_out, C_in=C_in, relu=relu)

    out_dtype = x_nchw.dtype
    itemsize = jnp.dtype(out_dtype).itemsize
    in_tile_b = TH_in * W_pad * C_in * itemsize
    out_tile_b = TH * W_out * C_out_p * itemsize
    scratch_b = TH * W_out * K_dim * itemsize + TH * W_out * C_out_p * 4
    fixed_b = K_dim * C_out_p * itemsize + 2 * C_out_p * 4
    vmem_limit = int(min(64 * 2 ** 20,
                         max(4 * (2 * (in_tile_b + out_tile_b) + scratch_b + fixed_b),
                             16 * 2 ** 20)))

    out = pl.pallas_call(
        kern,
        out_shape=jax.ShapeDtypeStruct((N * T, TH * W_out, C_out_p), out_dtype),
        grid=(N * T,),
        in_specs=[
            pl.BlockSpec((1, TH_in, W_pad, C_in), lambda i: (i, 0, 0, 0)),
            pl.BlockSpec((K_dim, C_out_p), lambda i: (0, 0)),
            pl.BlockSpec((1, C_out_p), lambda i: (0, 0)),
            pl.BlockSpec((1, C_out_p), lambda i: (0, 0)),
        ],
        out_specs=pl.BlockSpec((1, TH * W_out, C_out_p), lambda i: (i, 0, 0)),
        compiler_params=pltpu.CompilerParams(
            dimension_semantics=("parallel",),
            vmem_limit_bytes=vmem_limit),
    )(tiles, w2d, scale, shift)

    out = out.reshape(N, H_out_p, W_out, C_out_p)[:, :H_out, :, :C_out]
    return jnp.transpose(out, (0, 3, 1, 2))            # back to NCHW


def _reference(x_nchw, weight, bias, *, stride, relu, same_padding):
    pad = (weight.shape[2] - 1) // 2 if same_padding else 0
    y = jax.lax.conv_general_dilated(
        x_nchw, weight,
        window_strides=(stride, stride),
        padding=((pad, pad), (pad, pad)),
        dimension_numbers=("NCHW", "OIHW", "NCHW"))
    y = y + bias.reshape(1, -1, 1, 1)
    if relu:
        y = jnp.maximum(y, 0.0)
    return y


if __name__ == "__main__":
    # Module config: Conv2d(in_channels=4, out_channels=8, kernel_size=3,
    #                       stride=1, relu=True, same_padding=True, bn=False)
    N, C_in, H, W = 2, 4, 16, 16
    C_out, K = 8, 3
    stride, relu, same_padding = 1, True, True

    key = jax.random.PRNGKey(0)
    kx, kw, kb = jax.random.split(key, 3)
    x = jax.random.normal(kx, (N, C_in, H, W), dtype=jnp.float32)
    fan_in = C_in * K * K
    bound = 1.0 / np.sqrt(fan_in)
    weight = jax.random.uniform(kw, (C_out, C_in, K, K), jnp.float32, -bound, bound)
    bias = jax.random.uniform(kb, (C_out,), jnp.float32, -bound, bound)

    out = conv2d_forward(x, weight, bias, stride=stride, relu=relu,
                         same_padding=same_padding, bn=False)
    out = jax.block_until_ready(out)

    ref = _reference(x, weight, bias, stride=stride, relu=relu,
                     same_padding=same_padding)
    np.testing.assert_allclose(np.asarray(out), np.asarray(ref),
                               rtol=1e-4, atol=1e-4)
    print("KERNEL_OK")
</pallas_src>

<mosaic_0001>
module attributes {stable_mosaic.version = 11 : i64} {
  func.func @_conv2d_kernel(%arg0: i32, %arg1: memref<1x10x18x4xf32, #tpu.memory_space<vmem>>, %arg2: memref<36x128xf32, #tpu.memory_space<vmem>>, %arg3: memref<1x128xf32, #tpu.memory_space<vmem>>, %arg4: memref<1x128xf32, #tpu.memory_space<vmem>>, %arg5: memref<1x128x128xf32, #tpu.memory_space<vmem>>) attributes {dimension_semantics = [#tpu.dimension_semantics<parallel>], iteration_bounds = array<i64: 4>, scalar_prefetch = 0 : i64, scratch_operands = 0 : i64, tpu.core_type = #tpu.core_type<tc>, window_params = [{transform_indices = @transform_0, window_bounds = array<i64: 1, 10, 18, 4>}, {pipeline_mode = #tpu.pipeline_mode<synchronous>, transform_indices = @transform_1, window_bounds = array<i64: 36, 128>}, {pipeline_mode = #tpu.pipeline_mode<synchronous>, transform_indices = @transform_2, window_bounds = array<i64: 1, 128>}, {pipeline_mode = #tpu.pipeline_mode<synchronous>, transform_indices = @transform_3, window_bounds = array<i64: 1, 128>}, {transform_indices = @transform_4, window_bounds = array<i64: 1, 128, 128>}]} {
    %c0 = arith.constant 0 : index
    %c0_0 = arith.constant 0 : index
    %c0_1 = arith.constant 0 : index
    %c0_2 = arith.constant 0 : index
    %0 = vector.load %arg1[%c0, %c0_0, %c0_1, %c0_2] : memref<1x10x18x4xf32, #tpu.memory_space<vmem>>, vector<1x10x18x4xf32>
    %1 = vector.shape_cast %0 : vector<1x10x18x4xf32> to vector<10x18x4xf32>
    %2 = vector.extract_strided_slice %1 {offsets = [0, 0, 0], sizes = [8, 16, 4], strides = [1, 1, 1]} : vector<10x18x4xf32> to vector<8x16x4xf32>
    %3 = vector.extract_strided_slice %1 {offsets = [0, 1, 0], sizes = [8, 16, 4], strides = [1, 1, 1]} : vector<10x18x4xf32> to vector<8x16x4xf32>
    %4 = vector.extract_strided_slice %1 {offsets = [0, 2, 0], sizes = [8, 16, 4], strides = [1, 1, 1]} : vector<10x18x4xf32> to vector<8x16x4xf32>
    %5 = vector.extract_strided_slice %1 {offsets = [1, 0, 0], sizes = [8, 16, 4], strides = [1, 1, 1]} : vector<10x18x4xf32> to vector<8x16x4xf32>
    %6 = vector.extract_strided_slice %1 {offsets = [1, 1, 0], sizes = [8, 16, 4], strides = [1, 1, 1]} : vector<10x18x4xf32> to vector<8x16x4xf32>
    %7 = vector.extract_strided_slice %1 {offsets = [1, 2, 0], sizes = [8, 16, 4], strides = [1, 1, 1]} : vector<10x18x4xf32> to vector<8x16x4xf32>
    %8 = vector.extract_strided_slice %1 {offsets = [2, 0, 0], sizes = [8, 16, 4], strides = [1, 1, 1]} : vector<10x18x4xf32> to vector<8x16x4xf32>
    %9 = vector.extract_strided_slice %1 {offsets = [2, 1, 0], sizes = [8, 16, 4], strides = [1, 1, 1]} : vector<10x18x4xf32> to vector<8x16x4xf32>
    %10 = vector.extract_strided_slice %1 {offsets = [2, 2, 0], sizes = [8, 16, 4], strides = [1, 1, 1]} : vector<10x18x4xf32> to vector<8x16x4xf32>
    %11 = tpu.concatenate %2, %3, %4, %5, %6, %7, %8, %9, %10 in 2 : vector<8x16x4xf32>, vector<8x16x4xf32>, vector<8x16x4xf32>, vector<8x16x4xf32>, vector<8x16x4xf32>, vector<8x16x4xf32>, vector<8x16x4xf32>, vector<8x16x4xf32>, vector<8x16x4xf32> -> vector<8x16x36xf32>
    %12 = vector.shape_cast %11 : vector<8x16x36xf32> to vector<128x36xf32>
    %c0_3 = arith.constant 0 : index
    %c0_4 = arith.constant 0 : index
    %13 = vector.load %arg2[%c0_3, %c0_4] : memref<36x128xf32, #tpu.memory_space<vmem>>, vector<36x128xf32>
    %cst = arith.constant dense<0.000000e+00> : vector<128x128xf32>
    %14 = tpu.matmul %12, %13, %cst {dimension_numbers = #tpu.dot_dimension_numbers<[1], [0], [0], [1], [0, 0, 1, 1], [], []>} : vector<128x36xf32>, vector<36x128xf32>, vector<128x128xf32> -> vector<128x128xf32>
    %c0_5 = arith.constant 0 : index
    %c0_6 = arith.constant 0 : index
    %15 = vector.load %arg3[%c0_5, %c0_6] : memref<1x128xf32, #tpu.memory_space<vmem>>, vector<1x128xf32>
    %16 = vector.broadcast %15 : vector<1x128xf32> to vector<128x128xf32>
    %17 = arith.mulf %14, %16 : vector<128x128xf32>
    %c0_7 = arith.constant 0 : index
    %c0_8 = arith.constant 0 : index
    %18 = vector.load %arg4[%c0_7, %c0_8] : memref<1x128xf32, #tpu.memory_space<vmem>>, vector<1x128xf32>
    %19 = vector.broadcast %18 : vector<1x128xf32> to vector<128x128xf32>
    %20 = arith.addf %17, %19 : vector<128x128xf32>
    %cst_9 = arith.constant 0.000000e+00 : f32
    %21 = vector.broadcast %cst_9 : f32 to vector<128x128xf32>
    %22 = arith.maximumf %20, %21 : vector<128x128xf32>
    %c0_10 = arith.constant 0 : index
    %c0_11 = arith.constant 0 : index
    %c0_12 = arith.constant 0 : index
    %23 = vector.load %arg5[%c0_10, %c0_11, %c0_12] : memref<1x128x128xf32, #tpu.memory_space<vmem>>, vector<1x128x128xf32>
    %24 = vector.shape_cast %23 : vector<1x128x128xf32> to vector<128x128xf32>
    %25 = vector.shape_cast %22 : vector<128x128xf32> to vector<1x128x128xf32>
    tpu.vector_store %arg5[%c0_10, %c0_11, %c0_12], %25 {strides = array<i32>} : memref<1x128x128xf32, #tpu.memory_space<vmem>>, vector<1x128x128xf32>,
    return
  }
  func.func @transform_0(%arg0: i32) -> (i32, i32, i32, i32) {
    %c0_i32 = arith.constant 0 : i32
    %c0_i32_0 = arith.constant 0 : i32
    %c0_i32_1 = arith.constant 0 : i32
    %c0_i32_2 = arith.constant 0 : i32
    return %arg0, %c0_i32, %c0_i32_0, %c0_i32_1 : i32, i32, i32, i32
  }
  func.func @transform_1(%arg0: i32) -> (i32, i32) {
    %c0_i32 = arith.constant 0 : i32
    %c0_i32_0 = arith.constant 0 : i32
    %c0_i32_1 = arith.constant 0 : i32
    return %c0_i32, %c0_i32_0 : i32, i32
  }
  func.func @transform_2(%arg0: i32) -> (i32, i32) {
    %c0_i32 = arith.constant 0 : i32
    %c0_i32_0 = arith.constant 0 : i32
    %c0_i32_1 = arith.constant 0 : i32
    return %c0_i32, %c0_i32_0 : i32, i32
  }
  func.func @transform_3(%arg0: i32) -> (i32, i32) {
    %c0_i32 = arith.constant 0 : i32
    %c0_i32_0 = arith.constant 0 : i32
    %c0_i32_1 = arith.constant 0 : i32
    return %c0_i32, %c0_i32_0 : i32, i32
  }
  func.func @transform_4(%arg0: i32) -> (i32, i32, i32) {
    %c0_i32 = arith.constant 0 : i32
    %c0_i32_0 = arith.constant 0 : i32
    %c0_i32_1 = arith.constant 0 : i32
    return %arg0, %c0_i32, %c0_i32_0 : i32, i32, i32
  }
}

</mosaic_0001>

<bundles_post_ra>
// kernel: tpu_custom_call.1
= control target key start
LH: loop header
LB: loop body
LE: loop exit
PB: predicated region body
PF: predicated region fallthrough
CT: control target
= control target key end

     0   :  { %9 = vsyncpa [#allocation3], 0  ;;  %s2288_s0 = inlined_call_operand.vmem [shape: f32[4,10,18,4], index: 0, kind: input, shape index: {}]   ;;  %s2289_s1 = inlined_call_operand.vmem [shape: f32[36,128], index: 1, kind: input, shape index: {}]   ;;  %s2290_s2 = inlined_call_operand.vmem [shape: f32[1,128], index: 2, kind: input, shape index: {}]   ;;  %s2291_s3 = inlined_call_operand.vmem [shape: f32[1,128], index: 3, kind: input, shape index: {}]   ;;  %s2292_s4 = inlined_call_operand.hbm [shape: f32[4,128,128], index: 4, kind: output, shape index: {}]  }
   0x1   :  { %11 = vsyncpa [#allocation3 + $0x1], 0  ;;  %s1477_s15 = smov 0   ;;  %s1479_s16 = smov 0  }
   0x2   :  { %s1481_s17 = smov 0   ;;  %s1483_s18 = smov 0  }
   0x3 LB: > { %s1498_s19 = sadd.s32 4294967295, %s1440_s18   ;;  %s1235_s20 = sadd.s32 4294967294, %s1440_s18   ;;  %s1440_s18 = sphi %s1483_s18, %s2325_s18   ;;  %s1436_s17 = sphi %s1481_s17, %s2324_s17   ;;  %s1432_s16 = sphi %s1479_s16, %s2323_s16   ;;  %s1428_s15 = sphi %s1477_s15, %s2322_s15  }
   0x4   : > { %s1502_s21 = sadd.s32 1, %s1440_s18   ;;  %s113_s22 = sadd.s32 1, %s1436_s17 }
   0x5   : > { %s110_s23 = ssub.s32 %s1440_s18, %s1502_s21  ;;  %p123_p0 = scmp.ne.s32.totalorder %s1436_s17, %s1432_s16 }
   0x6   : > { %p111_p1 = scmp.eq.s32.totalorder %s110_s23, 0  ;;  %p124_p2 = scmp.eq.s32.totalorder %s1498_s19, 3 }
   0x7   : > { %p129_p3 = scmp.ne.s32.totalorder %s1432_s16, %s1428_s15  ;;  %p130_p4 = scmp.eq.s32.totalorder %s1235_s20, 3 }
   0x8   : > { %s1513_s24 = scalar_select %p111_p1, %s1436_s17, %s113_s22  }
   0x9   : > { %p1515_p5 = por %p124_p2, %p123_p0  ;;  %p1519_p6 = por %p130_p4, %p129_p3 }
   0xa   : > { %p1238_p7 = scmp.ge.s32.totalorder %s1440_s18, 1  ;;  %p165_p8 = scmp.lt.s32.totalorder %s1440_s18, 5 }
   0xc   : > { %p166_p9 = pnand %p1238_p7, %p165_p8 }
   0xe   : > { %169 = sbr.rel (%p166_p9) target bundleno = 614 (0x266), region = 36 }
  0x13   : > { %p191_p10 = scmp.lt.s32.totalorder %s1498_s19, 3  ;;  %vm250_vm0 = vcmask 1046528   ;;  %s1442_s6 = smov 4   ;;  %vm339_vm1 = vcmask 1045504   ;;  %vm932_vm2 = vcmask 1043456   ;;  %vm742_vm3 = vcmask 31744  }
  0x14   : > { %s1443_s7 = smov 8   ;;  %s1444_s8 = smov 12   ;;  %vm759_vm4 = vcmask 64512   ;;  %vm776_vm5 = vcmask 97280   ;;  %vm793_vm6 = vcmask 130048   ;;  %vm810_vm7 = vcmask 162816  }
  0x15   : > { %s192_s27 = scalar_select %p191_p10, %s1498_s19, 3  ;;  %vm827_vm8 = vcmask 195584   ;;  %vm844_vm9 = vcmask 228352   ;;  %vm861_vm10 = vcmask 261120   ;;  %vm883_vm11 = vcmask 293888  }
  0x16   : > { %s1445_s9 = smov 16   ;;  %s1446_s10 = smov 20  }
  0x17   : > { %s1331_s28 = smul.u32 240, %s192_s27  ;;  %s1447_s11 = smov 24  }
  0x18   : > { %s1448_s12 = smov 28   ;;  %s1449_s30 = smov 32  }
  0x19   : > { %s1530_s5 = scalar_lea.vmem %s2288_s0, %s1331_s28  ;;  %s1265_s20 = sshll.u32 %s1498_s19, 11 }
  0x1a   : > { %v1533_v0 = vld [vmem:[%s1530_s5 + $0x8] sm:$0xff]  ;;  %v198_v1 = vld [vmem:[%s1530_s5 + $0x10] sm:$0x3]  ;;  %v1537_v2 = vld [vmem:[%s1530_s5] sm:$0xff]  ;;  %s2238_s28 = scalar_lea.hbm %s2292_s4, %s1265_s20 }
  0x1b   : > { %v252_v3 = vrot.slane %v1533_v0, 1  ;;  %v254_v4 = vrot.slane %v198_v1, 1  ;;  %v251_v5 = vrot.slane %v1537_v2, 1  ;;  %v1542_v6 = vld [vmem:[%s1530_s5 + $0x68] sm:$0xff]  ;;  %v210_v7 = vld [vmem:[%s1530_s5 + $0x70] sm:$0x3] }
  0x1c   : > { %v272_v8 = vrot.slane %v1542_v6, 1  ;;  %v274_v9 = vrot.slane %v210_v7, 1  ;;  %v1547_v10 = vld [vmem:[%s1530_s5 + $0x60] sm:$0xff]  ;;  %v361_v14 = vrot.slane %v1542_v6, 2  ;;  %v340_v15 = vrot.slane %v1537_v2, 2  ;;  %v1583_v26 = vld [vmem:[%s1530_s5 + $0x78] sm:$0xff] }
  0x1d   : > { %v255_v11 = vsel %vm250_vm0, %v252_v3, %v254_v4  ;;  %v253_v12 = vsel %vm250_vm0, %v251_v5, %v252_v3  ;;  %v271_v13 = vrot.slane %v1547_v10, 1  ;;  %v360_v18 = vrot.slane %v1547_v10, 2  ;;  %v1586_v27 = vld [vmem:[%s1530_s5 + $0x18] sm:$0xff]  ;;  %v1589_v28 = vld [vmem:[%s1530_s5 + $0x80] sm:$0xff]  ;;  %v213_v36 = vld [vmem:[%s1530_s5 + $0x88] sm:$0x3] }
  0x1e   : > { %293 = vrot.lane.b32.xlu1 %v255_v11, %s1442_s6  ;;  %291 = vrot.lane.b32.xlu0 %v253_v12, %s1442_s6  ;;  %v1557_v16 = vsel %vm250_vm0, %v272_v8, %v274_v9  ;;  %v341_v19 = vrot.slane %v1533_v0, 2  ;;  %v363_v22 = vrot.slane %v210_v7, 2  ;;  %v343_v23 = vrot.slane %v198_v1, 2  ;;  %v1592_v29 = vld [vmem:[%s1530_s5 + $0x20] sm:$0xff]  ;;  %v201_v37 = vld [vmem:[%s1530_s5 + $0x28] sm:$0x3] }
  0x1f   : > { %v1560_v17 = vsel %vm250_vm0, %v271_v13, %v272_v8  ;;  %v1569_v20 = vsel %vm339_vm1, %v360_v18, %v361_v14  ;;  %v276_v30 = vrot.slane %v1583_v26, 1  ;;  %v277_v31 = vrot.slane %v1589_v28, 1  ;;  %v1650_v52 = vld [vmem:[%s1530_s5 + $0x90] sm:$0xff]  ;;  %v1663_v54 = vld [vmem:[%s1530_s5 + $0x98] sm:$0xff]  ;;  %v216_v62 = vld [vmem:[%s1530_s5 + $0xa0] sm:$0x3] }
  0x20   : > { %v342_v21 = vsel %vm339_vm1, %v340_v15, %v341_v19  ;;  %v1576_v24 = vsel %vm339_vm1, %v361_v14, %v363_v22  ;;  %v344_v25 = vsel %vm339_vm1, %v341_v19, %v343_v23  ;;  %v256_v32 = vrot.slane %v1586_v27, 1  ;;  %v1653_v53 = vld [vmem:[%s1530_s5 + $0x30] sm:$0xff]  ;;  %v1666_v55 = vld [vmem:[%s1530_s5 + $0x38] sm:$0xff]  ;;  %v204_v63 = vld [vmem:[%s1530_s5 + $0x40] sm:$0x3] }
  0x21   : > { %v257_v33 = vrot.slane %v1592_v29, 1  ;;  %v1607_v34 = vsel %vm250_vm0, %v276_v30, %v277_v31  ;;  %v279_v38 = vrot.slane %v213_v36, 1  ;;  %v259_v39 = vrot.slane %v201_v37, 1  ;;  %2308 = vst [vmem:[#allocation9_spill] sm:$0xff] %v1666_v55  ;;  %v882_v12 = vld [vmem:[%s2289_s1 + $0x20] sm:$0xf] }
  0x22   : > { %309 = vrot.lane.b32.xlu1 %v1557_v16, %s1442_s6  ;;  %307 = vrot.lane.b32.xlu0 %v1560_v17, %s1442_s6  ;;  %2304 = vst [vmem:[#allocation5_spill] sm:$0xff] %v1607_v34  ;;  %v365_v40 = vrot.slane %v1583_v26, 2  ;;  %v366_v41 = vrot.slane %v1589_v28, 2  ;;  %v345_v44 = vrot.slane %v1586_v27, 2  ;;  %v346_v45 = vrot.slane %v1592_v29, 2  ;;  %v881_v13 = vld [vmem:[%s2289_s1 + $0x18] sm:$0xff] }
  0x23   : > { %v258_v35 = vsel %vm250_vm0, %v256_v32, %v257_v33  ;;  %v1621_v42 = vsel %vm250_vm0, %v277_v31, %v279_v38  ;;  %v260_v43 = vsel %vm250_vm0, %v257_v33, %v259_v39  ;;  %v368_v48 = vrot.slane %v213_v36, 2  ;;  %1287 = vmatprep.subr.msk.mxu0 %vm932_vm2, %v882_v12  ;;  %1321 = vmatprep.subr.msk.mxu1 %vm932_vm2, %v882_v12  ;;  %v880_v18 = vld [vmem:[%s2289_s1 + $0x10] sm:$0xff]  ;;  %v879_v19 = vld [vmem:[%s2289_s1 + $0x8] sm:$0xff] }
  0x24   : > { %2305 = vst [vmem:[#allocation6_spill] sm:$0xff] %v1621_v42  ;;  %v1630_v46 = vsel %vm339_vm1, %v365_v40, %v366_v41  ;;  %v347_v47 = vsel %vm339_vm1, %v345_v44, %v346_v45  ;;  %v348_v49 = vrot.slane %v201_v37, 2  ;;  %v281_v56 = vrot.slane %v1650_v52, 1  ;;  %1288 = vmatpush3.msk.msra.mxu0 %vm932_vm2, %v882_v12  ;;  %1326 = vmatpush3.msk.msra.mxu1 %vm932_vm2, %v882_v12  ;;  %v1736_v31 = vld [vmem:[%s1530_s5 + $0xa8] sm:$0xff]  ;;  %v1760_v40 = vld [vmem:[%s1530_s5 + $0xb0] sm:$0xff] }
  0x25   : > { %2306 = vst [vmem:[#allocation7_spill] sm:$0xff] %v1630_v46  ;;  %v1643_v50 = vsel %vm339_vm1, %v366_v41, %v368_v48  ;;  %v282_v57 = vrot.slane %v1663_v54, 1  ;;  %v261_v58 = vrot.slane %v1653_v53, 1  ;;  %v262_v59 = vrot.slane %v1666_v55, 1  ;;  %1289 = vmatprep.subr.mxu0 %v881_v13  ;;  %1322 = vmatprep.subr.mxu1 %v881_v13  ;;  %2309 = vst [vmem:[#allocation10_spill] sm:$0xff] %v1736_v31  ;;  %v1739_v32 = vld [vmem:[%s1530_s5 + $0x48] sm:$0xff] }
  0x26   : > { %396 = vrot.lane.b32.xlu1 %v1569_v20, %s1443_s7  ;;  %380 = vrot.lane.b32.xlu0 %v342_v21, %s1443_s7  ;;  %2307 = vst [vmem:[#allocation8_spill] sm:$0xff] %v1643_v50  ;;  %v349_v51 = vsel %vm339_vm1, %v346_v45, %v348_v49  ;;  %v284_v1 = vrot.slane %v216_v62, 1  ;;  %v264_v3 = vrot.slane %v204_v63, 1  ;;  %v370_v4 = vrot.slane %v1650_v52, 2  ;;  %v878_v21 = vld [vmem:[%s2289_s1] sm:$0xff]  ;;  %2310 = vst [vmem:[#allocation11_spill] sm:$0xff] %v1739_v32 }
  0x27   : > { %v283_v60 = vsel %vm250_vm0, %v281_v56, %v282_v57  ;;  %v263_v61 = vsel %vm250_vm0, %v261_v58, %v262_v59  ;;  %v371_v5 = vrot.slane %v1663_v54, 2  ;;  %v350_v7 = vrot.slane %v1653_v53, 2  ;;  %1290 = vmatpush3.msra.mxu0 %v881_v13  ;;  %1327 = vmatpush3.msra.mxu1 %v881_v13  ;;  %2311 = vst [vmem:[#allocation12_spill] sm:$0xff] %v1760_v40  ;;  %v1763_v41 = vld [vmem:[%s1530_s5 + $0x50] sm:$0xff] }
  0x28   : > { %v285_v8 = vsel %vm250_vm0, %v282_v57, %v284_v1  ;;  %v265_v9 = vsel %vm250_vm0, %v262_v59, %v264_v3  ;;  %v351_v11 = vrot.slane %v1666_v55, 2  ;;  %1291 = vmatprep.subr.mxu0 %v880_v18  ;;  %1323 = vmatprep.subr.mxu1 %v880_v18  ;;  %v373_v22 = vrot.slane %v216_v62, 2  ;;  %2312 = vst [vmem:[#allocation13_spill] sm:$0xff] %v1763_v41  ;;  %v219_v59 = vld [vmem:[%s1530_s5 + $0xb8] sm:$0x3] }
  0x29   : > { %v372_v14 = vsel %vm339_vm1, %v370_v4, %v371_v5  ;;  %1292 = vmatpush3.msra.mxu0 %v880_v18  ;;  %1328 = vmatpush3.msra.mxu1 %v880_v18  ;;  %v353_v23 = vrot.slane %v204_v63, 2  ;;  %v287_v44 = vrot.slane %v1760_v40, 1  ;;  %v266_v45 = vrot.slane %v1739_v32, 1 }
  0x2a   : > { %398 = vrot.lane.b32.xlu1 %v1576_v24, %s1443_s7  ;;  %382 = vrot.lane.b32.xlu0 %v344_v25, %s1443_s7  ;;  %v352_v15 = vsel %vm339_vm1, %v350_v7, %v351_v11  ;;  %v374_v25 = vsel %vm339_vm1, %v371_v5, %v373_v22  ;;  %v289_v63 = vrot.slane %v219_v59, 1  ;;  %v356_v12 = vrot.slane %v1763_v41, 2 }
  0x2b   : > { %1293 = vmatprep.subr.mxu0 %v879_v19  ;;  %1324 = vmatprep.subr.mxu1 %v879_v19  ;;  %v354_v30 = vsel %vm339_vm1, %v351_v11, %v353_v23  ;;  %v355_v11 = vrot.slane %v1739_v32, 2 }
  0x2c   : > { %1294 = vmatpush3.msra.mxu0 %v879_v19  ;;  %1329 = vmatpush3.msra.mxu1 %v879_v19  ;;  %v290_v5 = vsel %vm250_vm0, %v287_v44, %v289_v63 }
  0x2d   : > { %1295 = vmatprep.subr.mxu0 %v878_v21  ;;  %1325 = vmatprep.subr.mxu1 %v878_v21  ;;  %v357_v18 = vsel %vm339_vm1, %v355_v11, %v356_v12 }
  0x2e   : > { %446 = vrot.lane.b32.xlu1 %v1583_v26, %s1444_s8  ;;  %430 = vrot.lane.b32.xlu0 %v1586_v27, %s1444_s8 }
  0x2f   : > { %1296 = vmatpush3.msra.mxu0 %v878_v21  ;;  %1330 = vmatpush3.msra.mxu1 %v878_v21 }
  0x32   : > { %448 = vrot.lane.b32.xlu1 %v1589_v28, %s1444_s8  ;;  %432 = vrot.lane.b32.xlu0 %v1592_v29, %s1444_s8 }
  0x36   : > { %500 = vrot.lane.b32.xlu1 %v1607_v34, %s1445_s9  ;;  %484 = vrot.lane.b32.xlu0 %v258_v35, %s1445_s9 }
  0x3a   : > { %311 = vrot.lane.b32.xlu1 %v1607_v34, %s1442_s6  ;;  %295 = vrot.lane.b32.xlu0 %v258_v35, %s1442_s6 }
  0x3e   : > { %502 = vrot.lane.b32.xlu1 %v1621_v42, %s1445_s9  ;;  %486 = vrot.lane.b32.xlu0 %v260_v43, %s1445_s9 }
  0x42   : > { %553 = vrot.lane.b32.xlu1 %v1630_v46, %s1446_s10  ;;  %537 = vrot.lane.b32.xlu0 %v347_v47, %s1446_s10 }
  0x46   : > { %313 = vrot.lane.b32.xlu1 %v1621_v42, %s1442_s6  ;;  %297 = vrot.lane.b32.xlu0 %v260_v43, %s1442_s6  ;;  %v286_v43 = vrot.slane %v1736_v31, 1 }
  0x4a   : > { %400 = vrot.lane.b32.xlu1 %v1630_v46, %s1443_s7  ;;  %384 = vrot.lane.b32.xlu0 %v347_v47, %s1443_s7  ;;  %v267_v47 = vrot.slane %v1763_v41, 1 }
  0x4c   : > { %v268_v56 = vsel %vm250_vm0, %v266_v45, %v267_v47 }
  0x4e   : > { %555 = vrot.lane.b32.xlu1 %v1643_v50, %s1446_s10  ;;  %539 = vrot.lane.b32.xlu0 %v349_v51, %s1446_s10 }
  0x52   : > { %603 = vrot.lane.b32.xlu1 %v1650_v52, %s1447_s11  ;;  %587 = vrot.lane.b32.xlu0 %v1653_v53, %s1447_s11 }
  0x56   : > { %402 = vrot.lane.b32.xlu1 %v1643_v50, %s1443_s7  ;;  %386 = vrot.lane.b32.xlu0 %v349_v51, %s1443_s7  ;;  %v288_v51 = vsel %vm250_vm0, %v286_v43, %v287_v44  ;;  %v378_v43 = vrot.slane %v219_v59, 2 }
  0x5a   : > { %450 = vrot.lane.b32.xlu1 %v1650_v52, %s1444_s8  ;;  %434 = vrot.lane.b32.xlu0 %v1653_v53, %s1444_s8 }
  0x5e   : > { %605 = vrot.lane.b32.xlu1 %v1663_v54, %s1447_s11  ;;  %589 = vrot.lane.b32.xlu0 %v1666_v55, %s1447_s11 }
  0x62   : > { %657 = vrot.lane.b32.xlu1 %v283_v60, %s1448_s12  ;;  %641 = vrot.lane.b32.xlu0 %v263_v61, %s1448_s12 }
  0x66   : > { %452 = vrot.lane.b32.xlu1 %v1663_v54, %s1444_s8  ;;  %436 = vrot.lane.b32.xlu0 %v1666_v55, %s1444_s8 }
  0x6a   : > { %504 = vrot.lane.b32.xlu1 %v283_v60, %s1445_s9  ;;  %488 = vrot.lane.b32.xlu0 %v263_v61, %s1445_s9 }
  0x6e   : > { %659 = vrot.lane.b32.xlu1 %v285_v8, %s1448_s12  ;;  %643 = vrot.lane.b32.xlu0 %v265_v9, %s1448_s12 }
  0x72   : > { %710 = vrot.lane.b32.xlu1 %v372_v14, %s1449_s30  ;;  %694 = vrot.lane.b32.xlu0 %v352_v15, %s1449_s30 }
  0x76   : > { %315 = vrot.lane.b32.xlu1 %v283_v60, %s1442_s6  ;;  %299 = vrot.lane.b32.xlu0 %v263_v61, %s1442_s6  ;;  %v207_v60 = vld [vmem:[%s1530_s5 + $0x58] sm:$0x3] }
  0x77   : > { %v269_v1 = vrot.slane %v207_v60, 1  ;;  %v358_v44 = vrot.slane %v207_v60, 2 }
  0x79   : > { %v270_v7 = vsel %vm250_vm0, %v267_v47, %v269_v1 }
  0x7a   : > { %506 = vrot.lane.b32.xlu1 %v285_v8, %s1445_s9  ;;  %490 = vrot.lane.b32.xlu0 %v265_v9, %s1445_s9 }
  0x7e   : > { %557 = vrot.lane.b32.xlu1 %v372_v14, %s1446_s10  ;;  %541 = vrot.lane.b32.xlu0 %v352_v15, %s1446_s10 }
  0x82   : > { %712 = vrot.lane.b32.xlu1 %v374_v25, %s1449_s30  ;;  %696 = vrot.lane.b32.xlu0 %v354_v30, %s1449_s30 }
  0x86   : > { %317 = vrot.lane.b32.xlu1 %v285_v8, %s1442_s6  ;;  %301 = vrot.lane.b32.xlu0 %v265_v9, %s1442_s6  ;;  %v375_v8 = vrot.slane %v1736_v31, 2  ;;  %v376_v9 = vrot.slane %v1760_v40, 2 }
  0x8a   : > { %404 = vrot.lane.b32.xlu1 %v372_v14, %s1443_s7  ;;  %388 = vrot.lane.b32.xlu0 %v352_v15, %s1443_s7  ;;  %v377_v15 = vsel %vm339_vm1, %v375_v8, %v376_v9 }
  0x8e   : > { %559 = vrot.lane.b32.xlu1 %v374_v25, %s1446_s10  ;;  %543 = vrot.lane.b32.xlu0 %v354_v30, %s1446_s10 }
  0x90   : > { %v1741_v33 = vpop.permute.xlu1 %293  ;;  %v1743_v35 = vpop.permute.xlu0 %291 }
  0x92   : > { %607 = vrot.lane.b32.xlu1 %v1736_v31, %s1447_s11  ;;  %591 = vrot.lane.b32.xlu0 %v1739_v32, %s1447_s11 }
  0x94   : > { %v1749_v36 = vpop.permute.xlu1 %309  ;;  %v1751_v37 = vpop.permute.xlu0 %307 }
  0x96   : > { %406 = vrot.lane.b32.xlu1 %v374_v25, %s1443_s7  ;;  %390 = vrot.lane.b32.xlu0 %v354_v30, %s1443_s7 }
  0x98   : > { %v1755_v38 = vpop.permute.xlu1 %396  ;;  %v1757_v39 = vpop.permute.xlu0 %380 }
  0x9a   : > { %454 = vrot.lane.b32.xlu1 %v1736_v31, %s1444_s8  ;;  %438 = vrot.lane.b32.xlu0 %v1739_v32, %s1444_s8 }
  0x9c   : > { %v1773_v48 = vpop.permute.xlu1 %398  ;;  %v1775_v49 = vpop.permute.xlu0 %382 }
  0x9e   : > { %609 = vrot.lane.b32.xlu1 %v1760_v40, %s1447_s11  ;;  %593 = vrot.lane.b32.xlu0 %v1763_v41, %s1447_s11 }
  0xa0   : > { %v1783_v57 = vpop.permute.xlu1 %446  ;;  %v1785_v58 = vpop.permute.xlu0 %430 }
  0xa2   : > { %661 = vrot.lane.b32.xlu1 %v288_v51, %s1448_s12  ;;  %645 = vrot.lane.b32.xlu0 %v268_v56, %s1448_s12 }
  0xa4   : > { %v1791_v61 = vpop.permute.xlu1 %448  ;;  %v1793_v62 = vpop.permute.xlu0 %432 }
  0xa6   : > { %456 = vrot.lane.b32.xlu1 %v1760_v40, %s1444_s8  ;;  %440 = vrot.lane.b32.xlu0 %v1763_v41, %s1444_s8  ;;  %v1875_v40 = vld [vmem:[%s1530_s5 + $0xc8] sm:$0xff] }
  0xa7   : > { %v480_v46 = vrot.slane %v1875_v40, 1 }
  0xa8   : > { %v1799_v3 = vpop.permute.xlu1 %500  ;;  %v1801_v4 = vpop.permute.xlu0 %484 }
  0xaa   : > { %508 = vrot.lane.b32.xlu1 %v288_v51, %s1445_s9  ;;  %492 = vrot.lane.b32.xlu0 %v268_v56, %s1445_s9 }
  0xac   : > { %v312_v13 = vpop.permute.xlu1 %311  ;;  %v296_v14 = vpop.permute.xlu0 %295 }
  0xad   : > { %v753_v32 = vsel %vm742_vm3, %v1583_v26, %v312_v13  ;;  %v745_v31 = vsel %vm742_vm3, %v1586_v27, %v296_v14 }
  0xae   : > { %663 = vrot.lane.b32.xlu1 %v290_v5, %s1448_s12  ;;  %647 = vrot.lane.b32.xlu0 %v270_v7, %s1448_s12 }
  0xb0   : > { %v1815_v19 = vpop.permute.xlu1 %502  ;;  %v1817_v21 = vpop.permute.xlu0 %486 }
  0xb2   : > { %714 = vrot.lane.b32.xlu1 %v377_v15, %s1449_s30  ;;  %698 = vrot.lane.b32.xlu0 %v357_v18, %s1449_s30 }
  0xb4   : > { %v1821_v22 = vpop.permute.xlu1 %553  ;;  %v1823_v23 = vpop.permute.xlu0 %537 }
  0xb6   : > { %319 = vrot.lane.b32.xlu1 %v288_v51, %s1442_s6  ;;  %303 = vrot.lane.b32.xlu0 %v268_v56, %s1442_s6  ;;  %v379_v51 = vsel %vm339_vm1, %v376_v9, %v378_v43  ;;  %v359_v56 = vsel %vm339_vm1, %v356_v12, %v358_v44  ;;  %v1858_v43 = vld [vmem:[%s1530_s5 + $0xc0] sm:$0xff] }
  0xb7   : > { %v479_v50 = vrot.slane %v1858_v43, 1 }
  0xb8   : > { %v1827_v25 = vpop.permute.xlu1 %313  ;;  %v1829_v30 = vpop.permute.xlu0 %297 }
  0xba   : > { %510 = vrot.lane.b32.xlu1 %v290_v5, %s1445_s9  ;;  %494 = vrot.lane.b32.xlu0 %v270_v7, %s1445_s9 }
  0xbc   : > { %v401_v45 = vpop.permute.xlu1 %400  ;;  %v385_v47 = vpop.permute.xlu0 %384 }
  0xbe   : > { %561 = vrot.lane.b32.xlu1 %v377_v15, %s1446_s10  ;;  %545 = vrot.lane.b32.xlu0 %v357_v18, %s1446_s10 }
  0xc0   : > { %v1837_v63 = vpop.permute.xlu1 %555  ;;  %v1839_v1 = vpop.permute.xlu0 %539 }
  0xc2   : > { %716 = vrot.lane.b32.xlu1 %v379_v51, %s1449_s30  ;;  %700 = vrot.lane.b32.xlu0 %v359_v56, %s1449_s30 }
  0xc4   : > { %v1843_v59 = vpop.permute.xlu1 %603  ;;  %v1845_v60 = vpop.permute.xlu0 %587 }
  0xc6   : > { %321 = vrot.lane.b32.xlu1 %v290_v5, %s1442_s6  ;;  %305 = vrot.lane.b32.xlu0 %v270_v7, %s1442_s6 }
  0xc8   : > { %v1849_v8 = vpop.permute.xlu1 %402  ;;  %v1851_v9 = vpop.permute.xlu0 %386 }
  0xca   : > { %408 = vrot.lane.b32.xlu1 %v377_v15, %s1443_s7  ;;  %392 = vrot.lane.b32.xlu0 %v357_v18, %s1443_s7 }
  0xcc   : > { %v451_v11 = vpop.permute.xlu1 %450  ;;  %v435_v12 = vpop.permute.xlu0 %434 }
  0xce   : > { %563 = vrot.lane.b32.xlu1 %v379_v51, %s1446_s10  ;;  %547 = vrot.lane.b32.xlu0 %v359_v56, %s1446_s10 }
  0xd0   : > { %v1860_v5 = vpop.permute.xlu1 %605  ;;  %v1862_v7 = vpop.permute.xlu0 %589 }
  0xd2   : > { %611 = vrot.lane.b32.xlu1 %v1858_v43, %s1447_s11  ;;  %595 = vrot.lane.b32.xlu0 %v1547_v10, %s1447_s11 }
  0xd4   : > { %v658_v15 = vpop.permute.xlu1 %657  ;;  %v642_v18 = vpop.permute.xlu0 %641 }
  0xd6   : > { %410 = vrot.lane.b32.xlu1 %v379_v51, %s1443_s7  ;;  %394 = vrot.lane.b32.xlu0 %v359_v56, %s1443_s7  ;;  %v770_v51 = vsel %vm759_vm4, %v753_v32, %v401_v45  ;;  %v762_v56 = vsel %vm759_vm4, %v745_v31, %v385_v47  ;;  %v743_v31 = vsel %vm742_vm3, %v1537_v2, %v1743_v35 }
  0xd7   : > { %v787_v13 = vsel %vm776_vm5, %v770_v51, %v451_v11  ;;  %v779_v42 = vsel %vm776_vm5, %v762_v56, %v435_v12  ;;  %v751_v32 = vsel %vm742_vm3, %v1547_v10, %v1751_v37  ;;  %v481_v47 = vsel %vm250_vm0, %v479_v50, %v480_v46 }
  0xd8   : > { %v1870_v44 = vpop.permute.xlu1 %452  ;;  %v1872_v41 = vpop.permute.xlu0 %436  ;;  %v768_v45 = vsel %vm759_vm4, %v751_v32, %v1755_v38  ;;  %v533_v32 = vrot.slane %v1875_v40, 2 }
  0xd9   : > { %v785_v2 = vsel %vm776_vm5, %v768_v45, %v1783_v57 }
  0xda   : > { %458 = vrot.lane.b32.xlu1 %v1858_v43, %s1444_s8  ;;  %442 = vrot.lane.b32.xlu0 %v1547_v10, %s1444_s8  ;;  %v802_v11 = vsel %vm793_vm6, %v785_v2, %v1799_v3 }
  0xdb   : > { %v819_v50 = vsel %vm810_vm7, %v802_v11, %v1821_v22 }
  0xdc   : > { %v505_v27 = vpop.permute.xlu1 %504  ;;  %v489_v14 = vpop.permute.xlu0 %488  ;;  %v836_v57 = vsel %vm827_vm8, %v819_v50, %v1843_v59 }
  0xdd   : > { %v1892_v34 = vsel %vm793_vm6, %v787_v13, %v505_v27  ;;  %v1895_v55 = vsel %vm793_vm6, %v779_v42, %v489_v14  ;;  %v760_v42 = vsel %vm759_vm4, %v743_v31, %v1757_v39  ;;  %v853_v3 = vsel %vm844_vm9, %v836_v57, %v658_v15 }
  0xde   : > { %613 = vrot.lane.b32.xlu1 %v1875_v40, %s1447_s11  ;;  %597 = vrot.lane.b32.xlu0 %v1542_v6, %s1447_s11  ;;  %v777_v10 = vsel %vm776_vm5, %v760_v42, %v1785_v58  ;;  %v746_v13 = vsel %vm742_vm3, %v1592_v29, %v1829_v30  ;;  %v532_v27 = vrot.slane %v1858_v43, 2 }
  0xdf   : > { %v794_v38 = vsel %vm793_vm6, %v777_v10, %v1801_v4  ;;  %v763_v31 = vsel %vm759_vm4, %v746_v13, %v1851_v9 }
  0xe0   : > { %v660_v35 = vpop.permute.xlu1 %659  ;;  %v644_v37 = vpop.permute.xlu0 %643  ;;  %v811_v39 = vsel %vm810_vm7, %v794_v38, %v1823_v23  ;;  %v222_v23 = vld [vmem:[%s1530_s5 + $0xd0] sm:$0x3]  ;;  %v780_v30 = vsel %vm776_vm5, %v763_v31, %v1872_v41 }
  0xe1   : > { %v828_v58 = vsel %vm827_vm8, %v811_v39, %v1845_v60  ;;  %v482_v59 = vrot.slane %v222_v23, 1 }
  0xe2   : > { %665 = vrot.lane.b32.xlu1 %v481_v47, %s1448_s12  ;;  %649 = vrot.lane.b32.xlu0 %v1560_v17, %s1448_s12  ;;  %v845_v4 = vsel %vm844_vm9, %v828_v58, %v642_v18  ;;  %v754_v18 = vsel %vm742_vm3, %v1589_v28, %v1827_v25 }
  0xe3   : > { %v771_v14 = vsel %vm759_vm4, %v754_v18, %v1849_v8  ;;  %v483_v25 = vsel %vm250_vm0, %v480_v46, %v482_v59  ;;  %v752_v46 = vsel %vm742_vm3, %v1542_v6, %v1749_v36 }
  0xe4   : > { %v711_v22 = vpop.permute.xlu1 %710  ;;  %v695_v12 = vpop.permute.xlu0 %694  ;;  %v788_v29 = vsel %vm776_vm5, %v771_v14, %v1870_v44  ;;  %v534_v44 = vsel %vm339_vm1, %v532_v27, %v533_v32 }
  0xe5   : > { %v870_v51 = vsel %vm861_vm10, %v853_v3, %v711_v22  ;;  %v862_v56 = vsel %vm861_vm10, %v845_v4, %v695_v12  ;;  %v224_v4 = vld [vmem:[%s1530_s5 + $0xe0] sm:$0xff] }
  0xe6   : > { %460 = vrot.lane.b32.xlu1 %v1875_v40, %s1444_s8  ;;  %1309 = vmatprep.mubr.msk.f32.mxu1 %vm883_vm11, %v870_v51  ;;  %v769_v40 = vsel %vm759_vm4, %v752_v46, %v1773_v48  ;;  %v637_v12 = vrot.slane %v224_v4, 1  ;;  %v2313_v51 = vld [vmem:[#allocation9_spill] sm:$0xff] }
  0xe7   : > { %444 = vrot.lane.b32.xlu0 %v1542_v6, %s1444_s8  ;;  %1297 = vmatprep.mubr.msk.f32.mxu0 %vm883_vm11, %v862_v56 }
  0xe8   : > { %v316_v60 = vpop.permute.xlu1 %315  ;;  %v300_v15 = vpop.permute.xlu0 %299 }
  0xe9   : > { %v755_v11 = vsel %vm742_vm3, %v1650_v52, %v316_v60  ;;  %v223_v52 = vld [vmem:[%s1530_s5 + $0xd8] sm:$0xff] }
  0xea   : > { %512 = vrot.lane.b32.xlu1 %v481_v47, %s1445_s9  ;;  %v636_v22 = vrot.slane %v223_v52, 1 }
  0xeb   : > { %496 = vrot.lane.b32.xlu0 %v1560_v17, %s1445_s9  ;;  %v744_v17 = vsel %vm742_vm3, %v1533_v0, %v1741_v33  ;;  %v786_v0 = vsel %vm776_vm5, %v769_v40, %v1791_v61 }
  0xec   : > { %v507_v43 = vpop.permute.xlu1 %506  ;;  %v491_v45 = vpop.permute.xlu0 %490  ;;  %v761_v41 = vsel %vm759_vm4, %v744_v17, %v1775_v49  ;;  %v803_v48 = vsel %vm793_vm6, %v786_v0, %v1815_v19 }
  0xed   : > { %v1963_v8 = vsel %vm793_vm6, %v788_v29, %v507_v43  ;;  %v1966_v9 = vsel %vm793_vm6, %v780_v30, %v491_v45  ;;  %v778_v33 = vsel %vm776_vm5, %v761_v41, %v1793_v62  ;;  %v820_v42 = vsel %vm810_vm7, %v803_v48, %v1837_v63  ;;  %v2314_v29 = vld [vmem:[#allocation5_spill] sm:$0xff]  ;;  %v2315_v45 = vld [vmem:[#allocation6_spill] sm:$0xff] }
  0xee   : > { %667 = vrot.lane.b32.xlu1 %v483_v25, %s1448_s12  ;;  %v795_v49 = vsel %vm793_vm6, %v778_v33, %v1817_v21  ;;  %v837_v61 = vsel %vm827_vm8, %v820_v42, %v1860_v5  ;;  %v535_v5 = vrot.slane %v222_v23, 2 }
  0xef   : > { %651 = vrot.lane.b32.xlu0 %v1557_v16, %s1448_s12  ;;  %v812_v47 = vsel %vm810_vm7, %v795_v49, %v1839_v1  ;;  %v854_v19 = vsel %vm844_vm9, %v837_v61, %v660_v35 }
  0xf0   : > { %v1986_v6 = vpop.permute.xlu1 %557  ;;  %v1988_v36 = vpop.permute.xlu0 %541  ;;  %v829_v62 = vsel %vm827_vm8, %v812_v47, %v1862_v7  ;;  %v2317_v47 = vld [vmem:[#allocation8_spill] sm:$0xff] }
  0xf1   : > { %v846_v21 = vsel %vm844_vm9, %v829_v62, %v644_v37  ;;  %v536_v37 = vsel %vm339_vm1, %v533_v32, %v535_v5  ;;  %v689_v32 = vrot.slane %v223_v52, 2 }
  0xf2   : > { %718 = vrot.lane.b32.xlu1 %v534_v44, %s1449_s30 }
  0xf3   : > { %702 = vrot.lane.b32.xlu0 %v1569_v20, %s1449_s30 }
  0xf4   : > { %v713_v2 = vpop.permute.xlu1 %712  ;;  %v697_v63 = vpop.permute.xlu0 %696 }
  0xf5   : > { %v871_v10 = vsel %vm861_vm10, %v854_v19, %v713_v2  ;;  %v863_v1 = vsel %vm861_vm10, %v846_v21, %v697_v63 }
  0xf6   : > { %514 = vrot.lane.b32.xlu1 %v483_v25, %s1445_s9  ;;  %1310 = vmatmul.mubr.msk.f32.vlgmr.msra.gmra.mxu1 %vm883_vm11, %v871_v10  ;;  %v690_v25 = vrot.slane %v224_v4, 2  ;;  %v821_v10 = vsel %vm810_vm7, %v1892_v34, %v1986_v6 }
  0xf7   : > { %498 = vrot.lane.b32.xlu0 %v1557_v16, %s1445_s9  ;;  %1298 = vmatmul.mubr.msk.f32.vlgmr.msra.gmra.mxu0 %vm883_vm11, %v863_v1  ;;  %v747_v16 = vsel %vm742_vm3, %v1653_v53, %v300_v15  ;;  %v813_v1 = vsel %vm810_vm7, %v1895_v55, %v1988_v36 }
  0xf8   : > { %v318_v7 = vpop.permute.xlu1 %317  ;;  %v302_v35 = vpop.permute.xlu0 %301  ;;  %v691_v17 = vsel %vm339_vm1, %v689_v32, %v690_v25 }
  0xf9   : > { %v756_v23 = vsel %vm742_vm3, %v1663_v54, %v318_v7  ;;  %v748_v56 = vsel %vm742_vm3, %v2313_v51, %v302_v35 }
  0xfa   : > { %565 = vrot.lane.b32.xlu1 %v534_v44, %s1446_s10  ;;  %v2316_v44 = vld [vmem:[#allocation7_spill] sm:$0xff] }
  0xfb   : > { %549 = vrot.lane.b32.xlu0 %v1569_v20, %s1446_s10 }
  0xfc   : > { %v405_v38 = vpop.permute.xlu1 %404  ;;  %v389_v50 = vpop.permute.xlu0 %388 }
  0xfd   : > { %v772_v39 = vsel %vm759_vm4, %v755_v11, %v405_v38  ;;  %v764_v57 = vsel %vm759_vm4, %v747_v16, %v389_v50 }
  0xfe   : > { %720 = vrot.lane.b32.xlu1 %v536_v37, %s1449_s30 }
  0xff   : > { %704 = vrot.lane.b32.xlu0 %v1576_v24, %s1449_s30 }
 0x100   : > { %v2027_v20 = vpop.permute.xlu1 %559  ;;  %v2029_v58 = vpop.permute.xlu0 %543 }
 0x102   : > { %567 = vrot.lane.b32.xlu1 %v536_v37, %s1446_s10 }
 0x103   : > { %551 = vrot.lane.b32.xlu0 %v1576_v24, %s1446_s10  ;;  %v225_v24 = vld [vmem:[%s1530_s5 + $0xe8] sm:$0x3]  ;;  %s188_s5 = sand.u32 1, %s1432_s16  }
 0x104   : > { %v608_v53 = vpop.permute.xlu1 %607  ;;  %v592_v3 = vpop.permute.xlu0 %591  ;;  %v639_v13 = vrot.slane %v225_v24, 1  ;;  %v692_v46 = vrot.slane %v225_v24, 2  ;;  %s2247_s19 = scalar_lea.sflag [#allocation3], %s188_s5 }
 0x105   : > { %v838_v5 = vsel %vm827_vm8, %v821_v10, %v608_v53  ;;  %v830_v7 = vsel %vm827_vm8, %v813_v1, %v592_v3  ;;  %v822_v3 = vsel %vm810_vm7, %v1963_v8, %v2027_v20  ;;  %v2318_v20 = vld [vmem:[#allocation10_spill] sm:$0xff] }
 0x106   : > { %615 = vrot.lane.b32.xlu1 %v223_v52, %s1447_s11  ;;  %v640_v30 = vsel %vm250_vm0, %v637_v12, %v639_v13  ;;  %v693_v0 = vsel %vm339_vm1, %v690_v25, %v692_v46 }
 0x107   : > { %599 = vrot.lane.b32.xlu0 %v1583_v26, %s1447_s11  ;;  %v638_v26 = vsel %vm250_vm0, %v636_v22, %v637_v12 }
 0x108   : > { %v407_v59 = vpop.permute.xlu1 %406  ;;  %v391_v60 = vpop.permute.xlu0 %390 }
 0x109   : > { %v773_v15 = vsel %vm759_vm4, %v756_v23, %v407_v59  ;;  %v765_v18 = vsel %vm759_vm4, %v748_v56, %v391_v60 }
 0x10a   : > { %617 = vrot.lane.b32.xlu1 %v224_v4, %s1447_s11  ;;  %v814_v4 = vsel %vm810_vm7, %v1966_v9, %v2029_v58 }
 0x10b   : > { %601 = vrot.lane.b32.xlu0 %v1589_v28, %s1447_s11  ;;  %s1239_s11 = sshll.u32 %s188_s5, 7 }
 0x10c   : > { %v455_v27 = vpop.permute.xlu1 %454  ;;  %v439_v54 = vpop.permute.xlu0 %438 }
 0x10d   : > { %v789_v14 = vsel %vm776_vm5, %v772_v39, %v455_v27  ;;  %v781_v31 = vsel %vm776_vm5, %v764_v57, %v439_v54 }
 0x10e   : > { %669 = vrot.lane.b32.xlu1 %v638_v26, %s1448_s12 }
 0x10f   : > { %653 = vrot.lane.b32.xlu0 %v2314_v29, %s1448_s12 }
 0x110   : > { %v610_v43 = vpop.permute.xlu1 %609  ;;  %v594_v28 = vpop.permute.xlu0 %593 }
 0x111   : > { %v839_v22 = vsel %vm827_vm8, %v822_v3, %v610_v43  ;;  %v831_v12 = vsel %vm827_vm8, %v814_v4, %v594_v28 }
 0x112   : > { %671 = vrot.lane.b32.xlu1 %v640_v30, %s1448_s12 }
 0x113   : > { %655 = vrot.lane.b32.xlu0 %v2315_v45, %s1448_s12  ;;  %s2194_s12 = scalar_lea.vmem [#allocation2], %s1239_s11 }
 0x114   : > { %v662_v40 = vpop.permute.xlu1 %661  ;;  %v646_v41 = vpop.permute.xlu0 %645  ;;  %s1173_s22 = sshll.u32 %s2194_s12, 4  ;;  %s2241_s22 = int_to_ptr.vmem [resolvable:$true] %s1173_s22 }
 0x115   : > { %v855_v35 = vsel %vm844_vm9, %v838_v5, %v662_v40  ;;  %v847_v37 = vsel %vm844_vm9, %v830_v7, %v646_v41  ;;  %s1380_s29 = scalar_lea.vmem %s2241_s22, 2048 }
 0x116   : > { %722 = vrot.lane.b32.xlu1 %v691_v17, %s1449_s30  ;;  %p1381_p11 = scmp.ne.s32.totalorder %s2241_s22, %s1380_s29 }
 0x117   : > { %706 = vrot.lane.b32.xlu0 %v2316_v44, %s1449_s30 }
 0x118   : > { %v457_v33 = vpop.permute.xlu1 %456  ;;  %v441_v48 = vpop.permute.xlu0 %440  ;;  %p1382_p12 = pnand %p1381_p11, %p1515_p5 }
 0x119   : > { %v790_v49 = vsel %vm776_vm5, %v773_v15, %v457_v33  ;;  %v782_v42 = vsel %vm776_vm5, %v765_v18, %v441_v48  ;;  %v2319_v15 = vld [vmem:[#allocation11_spill] sm:$0xff] }
 0x11a   : > { %724 = vrot.lane.b32.xlu1 %v693_v0, %s1449_s30  ;;  %p1383_p13 = pneg %p1382_p12 }
 0x11b   : > { %708 = vrot.lane.b32.xlu0 %v2317_v47, %s1449_s30  ;;  %s1450_s30 = smov [#allocation2]  }
 0x11c   : > { %v509_v61 = vpop.permute.xlu1 %508  ;;  %v493_v62 = vpop.permute.xlu0 %492  ;;  %s1384_s13 = sshll.u32 %s1450_s30, 4  ;;  %s1385_s13 = int_to_ptr.vmem [resolvable:$false] %s1384_s13 }
 0x11d   : > { %v2070_v19 = vsel %vm793_vm6, %v789_v14, %v509_v61  ;;  %v2073_v21 = vsel %vm793_vm6, %v781_v31, %v493_v62  ;;  %s1386_s14 = scalar_lea.vmem %s1385_s13, 4096  ;;  %p1387_p0 = scmp.lt.s32.totalorder %s2241_s22, %s1385_s13 }
 0x11e   : > { %p1388_p1 = scmp.lt.s32.totalorder %s1386_s14, %s1380_s29 }
 0x120   : > { %v664_v2 = vpop.permute.xlu1 %663  ;;  %v648_v63 = vpop.permute.xlu0 %647  ;;  %p1389_p2 = por %p1388_p1, %p1387_p0 }
 0x121   : > { %v856_v23 = vsel %vm844_vm9, %v839_v22, %v664_v2  ;;  %v848_v51 = vsel %vm844_vm9, %v831_v12, %v648_v63 }
 0x122   : > { %p1390_p3 = pnand %p1389_p2, %p1383_p13 }
 0x124   : > { %v715_v11 = vpop.permute.xlu1 %714  ;;  %v699_v16 = vpop.permute.xlu0 %698 }
 0x125   : > { %v872_v38 = vsel %vm861_vm10, %v855_v35, %v715_v11  ;;  %v864_v50 = vsel %vm861_vm10, %v847_v37, %v699_v16 }
 0x126   : > { %1300 = vmatprep.mubr.msk.f32.mxu0 %vm883_vm11, %v864_v50  ;;  %1312 = vmatprep.mubr.msk.f32.mxu1 %vm883_vm11, %v872_v38 }
 0x128   : > { %v320_v34 = vpop.permute.xlu1 %319  ;;  %v304_v55 = vpop.permute.xlu0 %303 }
 0x129   : > { %v757_v58 = vsel %vm742_vm3, %v2318_v20, %v320_v34  ;;  %v749_v18 = vsel %vm742_vm3, %v2319_v15, %v304_v55 }
 0x12c   : > { %v511_v6 = vpop.permute.xlu1 %510  ;;  %v495_v36 = vpop.permute.xlu0 %494 }
 0x12d   : > { %v807_v39 = vsel %vm793_vm6, %v790_v49, %v511_v6  ;;  %v799_v57 = vsel %vm793_vm6, %v782_v42, %v495_v36 }
 0x130   : > { %v562_v52 = vpop.permute.xlu1 %561  ;;  %v546_v53 = vpop.permute.xlu0 %545 }
 0x131   : > { %v823_v42 = vsel %vm810_vm7, %v2070_v19, %v562_v52  ;;  %v815_v47 = vsel %vm810_vm7, %v2073_v21, %v546_v53 }
 0x134   : > { %v717_v56 = vpop.permute.xlu1 %716  ;;  %v701_v59 = vpop.permute.xlu0 %700 }
 0x135   : > { %v873_v60 = vsel %vm861_vm10, %v856_v23, %v717_v56  ;;  %v865_v24 = vsel %vm861_vm10, %v848_v51, %v701_v59 }
 0x136   : > { %1301 = vmatmul.mubr.msk.f32.gmra.mxu0 %vm883_vm11, %v865_v24  ;;  %1313 = vmatmul.mubr.msk.f32.gmra.mxu1 %vm883_vm11, %v873_v60 }
 0x138   : > { %v2105_v8 = vpop.permute.xlu1 %321  ;;  %v2107_v9 = vpop.permute.xlu0 %305 }
 0x13c   : > { %v409_v26 = vpop.permute.xlu1 %408  ;;  %v393_v13 = vpop.permute.xlu0 %392 }
 0x13d   : > { %v774_v27 = vsel %vm759_vm4, %v757_v58, %v409_v26  ;;  %v766_v54 = vsel %vm759_vm4, %v749_v18, %v393_v13  ;;  %v2320_v58 = vld [vmem:[#allocation12_spill] sm:$0xff]  ;;  %v2321_v13 = vld [vmem:[#allocation13_spill] sm:$0xff] }
 0x13e   : > { %v758_v15 = vsel %vm742_vm3, %v2320_v58, %v2105_v8 }
 0x140   : > { %v564_v14 = vpop.permute.xlu1 %563  ;;  %v548_v31 = vpop.permute.xlu0 %547 }
 0x141   : > { %v824_v11 = vsel %vm810_vm7, %v807_v39, %v564_v14  ;;  %v816_v16 = vsel %vm810_vm7, %v799_v57, %v548_v31  ;;  %v750_v14 = vsel %vm742_vm3, %v2321_v13, %v2107_v9 }
 0x144   : > { %v612_v32 = vpop.permute.xlu1 %611  ;;  %v596_v25 = vpop.permute.xlu0 %595 }
 0x145   : > { %v840_v61 = vsel %vm827_vm8, %v823_v42, %v612_v32  ;;  %v832_v62 = vsel %vm827_vm8, %v815_v47, %v596_v25 }
 0x148   : > { %v411_v29 = vpop.permute.xlu1 %410  ;;  %v395_v30 = vpop.permute.xlu0 %394 }
 0x149   : > { %v767_v32 = vsel %vm759_vm4, %v750_v14, %v395_v30 }
 0x14c   : > { %v459_v43 = vpop.permute.xlu1 %458  ;;  %v443_v28 = vpop.permute.xlu0 %442 }
 0x14d   : > { %v791_v56 = vsel %vm776_vm5, %v774_v27, %v459_v43  ;;  %v783_v60 = vsel %vm776_vm5, %v766_v54, %v443_v28  ;;  %v775_v27 = vsel %vm759_vm4, %v758_v15, %v411_v29 }
 0x150   : > { %v614_v45 = vpop.permute.xlu1 %613  ;;  %v598_v17 = vpop.permute.xlu0 %597 }
 0x151   : > { %v841_v38 = vsel %vm827_vm8, %v824_v11, %v614_v45  ;;  %v833_v50 = vsel %vm827_vm8, %v816_v16, %v598_v17 }
 0x154   : > { %v666_v46 = vpop.permute.xlu1 %665  ;;  %v650_v40 = vpop.permute.xlu0 %649 }
 0x155   : > { %v857_v2 = vsel %vm844_vm9, %v840_v61, %v666_v46  ;;  %v849_v10 = vsel %vm844_vm9, %v832_v62, %v650_v40 }
 0x158   : > { %v461_v41 = vpop.permute.xlu1 %460 }
 0x159   : > { %v445_v44 = vpop.permute.xlu0 %444  ;;  %v792_v25 = vsel %vm776_vm5, %v775_v27, %v461_v41 }
 0x15a   : > { %v784_v45 = vsel %vm776_vm5, %v767_v32, %v445_v44 }
 0x15c   : > { %v513_v0 = vpop.permute.xlu1 %512 }
 0x15d   : > { %v497_v33 = vpop.permute.xlu0 %496  ;;  %v808_v24 = vsel %vm793_vm6, %v791_v56, %v513_v0 }
 0x15e   : > { %v800_v18 = vsel %vm793_vm6, %v783_v60, %v497_v33 }
 0x160   : > { %v668_v48 = vpop.permute.xlu1 %667 }
 0x161   : > { %v652_v49 = vpop.permute.xlu0 %651  ;;  %v858_v34 = vsel %vm844_vm9, %v841_v38, %v668_v48 }
 0x162   : > { %v850_v6 = vsel %vm844_vm9, %v833_v50, %v652_v49 }
 0x164   : > { %v719_v63 = vpop.permute.xlu1 %718 }
 0x165   : > { %v874_v1 = vsel %vm861_vm10, %v857_v2, %v719_v63  ;;  %v703_v5 = vpop.permute.xlu0 %702  ;;  %v2177_v2 = vld [vmem:[%s2290_s2] ss:$0 sm:$0xff] }
 0x166   : > { %v866_v7 = vsel %vm861_vm10, %v849_v10, %v703_v5  ;;  %1315 = vmatprep.mubr.msk.f32.mxu1 %vm883_vm11, %v874_v1  ;;  %v2182_v63 = vld [vmem:[%s2291_s3] ss:$0 sm:$0xff] }
 0x167   : > { %1303 = vmatprep.mubr.msk.f32.mxu0 %vm883_vm11, %v866_v7 }
 0x168   : > { %v515_v19 = vpop.permute.xlu1 %514 }
 0x169   : > { %v499_v21 = vpop.permute.xlu0 %498  ;;  %v809_v17 = vsel %vm793_vm6, %v792_v25, %v515_v19 }
 0x16a   : > { %v801_v40 = vsel %vm793_vm6, %v784_v45, %v499_v21 }
 0x16c   : > { %v566_v35 = vpop.permute.xlu1 %565 }
 0x16d   : > { %v550_v37 = vpop.permute.xlu0 %549  ;;  %v825_v26 = vsel %vm810_vm7, %v808_v24, %v566_v35 }
 0x16e   : > { %v817_v31 = vsel %vm810_vm7, %v800_v18, %v550_v37 }
 0x170   : > { %v721_v55 = vpop.permute.xlu1 %720 }
 0x171   : > { %v875_v36 = vsel %vm861_vm10, %v858_v34, %v721_v55  ;;  %v705_v52 = vpop.permute.xlu0 %704 }
 0x172   : > { %v867_v53 = vsel %vm861_vm10, %v850_v6, %v705_v52  ;;  %1316 = vmatmul.mubr.msk.f32.gmra.mxu1 %vm883_vm11, %v875_v36 }
 0x173   : > { %1304 = vmatmul.mubr.msk.f32.gmra.mxu0 %vm883_vm11, %v867_v53 }
 0x174   : > { %v568_v39 = vpop.permute.xlu1 %567 }
 0x175   : > { %v552_v57 = vpop.permute.xlu0 %551  ;;  %v826_v30 = vsel %vm810_vm7, %v809_v17, %v568_v39 }
 0x176   : > { %v818_v0 = vsel %vm810_vm7, %v801_v40, %v552_v57 }
 0x178   : > { %v616_v3 = vpop.permute.xlu1 %615 }
 0x179   : > { %v600_v4 = vpop.permute.xlu0 %599  ;;  %v842_v54 = vsel %vm827_vm8, %v825_v26, %v616_v3 }
 0x17a   : > { %v834_v8 = vsel %vm827_vm8, %v817_v31, %v600_v4 }
 0x17c   : > { %v618_v22 = vpop.permute.xlu1 %617 }
 0x17d   : > { %v602_v12 = vpop.permute.xlu0 %601  ;;  %v843_v44 = vsel %vm827_vm8, %v826_v30, %v618_v22 }
 0x17e   : > { %v835_v33 = vsel %vm827_vm8, %v818_v0, %v602_v12 }
 0x180   : > { %v670_v23 = vpop.permute.xlu1 %669 }
 0x181   : > { %v654_v51 = vpop.permute.xlu0 %653  ;;  %v859_v43 = vsel %vm844_vm9, %v842_v54, %v670_v23 }
 0x182   : > { %v851_v9 = vsel %vm844_vm9, %v834_v8, %v654_v51 }
 0x184   : > { %v672_v59 = vpop.permute.xlu1 %671 }
 0x185   : > { %v656_v20 = vpop.permute.xlu0 %655  ;;  %v860_v48 = vsel %vm844_vm9, %v843_v44, %v672_v59 }
 0x186   : > { %v852_v42 = vsel %vm844_vm9, %v835_v33, %v656_v20 }
 0x188   : > { %v723_v28 = vpop.permute.xlu1 %722 }
 0x189   : > { %v876_v29 = vsel %vm861_vm10, %v859_v43, %v723_v28  ;;  %v707_v46 = vpop.permute.xlu0 %706 }
 0x18a   : > { %v868_v41 = vsel %vm861_vm10, %v851_v9, %v707_v46  ;;  %1318 = vmatprep.mubr.msk.f32.mxu1 %vm883_vm11, %v876_v29 }
 0x18b   : > { %1306 = vmatprep.mubr.msk.f32.mxu0 %vm883_vm11, %v868_v41 }
 0x18c   : > { %v725_v49 = vpop.permute.xlu1 %724 }
 0x18d   : > { %v877_v47 = vsel %vm861_vm10, %v860_v48, %v725_v49  ;;  %v709_v61 = vpop.permute.xlu0 %708 }
 0x18e   : > { %v869_v62 = vsel %vm861_vm10, %v852_v42, %v709_v61  ;;  %1319 = vmatmul.mubr.msk.f32.gmra.mxu1 %vm883_vm11, %v877_v47 }
 0x18f   : > { %1307 = vmatmul.mubr.msk.f32.gmra.mxu0 %vm883_vm11, %v869_v62 }
 0x1b6   : > { %v1311_v10 = vpop.f32.mrf.mxu1 }
 0x1b7   : > { %v1299_v1 = vpop.f32.mrf.mxu0  ;;  %v1097_v5 = vmul.f32 %v1311_v10, %v2177_v2 }
 0x1b8   : > { %v1089_v7 = vmul.f32 %v1299_v1, %v2177_v2  ;;  %v1042_v19 = vpop.f32.mrf.mxu1 }
 0x1b9   : > { %v1120_v21 = vadd.f32 %v2182_v63, %v1097_v5  ;;  %v1002_v35 = vpop.f32.mrf.mxu0  ;;  %v1096_v37 = vmul.f32 %v2177_v2, %v1042_v19 }
 0x1ba   : > { %v1112_v11 = vadd.f32 %v2182_v63, %v1089_v7  ;;  %v1088_v16 = vmul.f32 %v2177_v2, %v1002_v35 }
 0x1bb   : > { %v1136_v38 = vmax.f32 %v1120_v21, 0.0  ;;  %v1119_v50 = vadd.f32 %v2182_v63, %v1096_v37 }
 0x1bc   : > { %v1128_v34 = vmax.f32 %v1112_v11, 0.0  ;;  %v1111_v55 = vadd.f32 %v2182_v63, %v1088_v16 }
 0x1bd   : > { %1152 = vst [vmem:[%s2194_s12 + $0x48] sm:$0xff] %v1136_v38  ;;  %v1135_v6 = vmax.f32 %v1119_v50, 0.0 }
 0x1be   : > { %1144 = vst [vmem:[%s2194_s12 + $0x8] sm:$0xff] %v1128_v34  ;;  %v1127_v36 = vmax.f32 %v1111_v55, 0.0 }
 0x1bf   : > { %1151 = vst [vmem:[%s2194_s12 + $0x40] sm:$0xff] %v1135_v6 }
 0x1c0   : > { %1143 = vst [vmem:[%s2194_s12] sm:$0xff] %v1127_v36 }
 0x1f6   : > { %v1302_v52 = vpop.f32.mrf.mxu0  ;;  %v1314_v53 = vpop.f32.mrf.mxu1 }
 0x1f7   : > { %v1091_v39 = vmul.f32 %v1302_v52, %v2177_v2  ;;  %v1099_v57 = vmul.f32 %v1314_v53, %v2177_v2 }
 0x1f8   : > { %v1012_v3 = vpop.f32.mrf.mxu0  ;;  %v1052_v4 = vpop.f32.mrf.mxu1 }
 0x1f9   : > { %v1114_v22 = vadd.f32 %v2182_v63, %v1091_v39  ;;  %v1122_v12 = vadd.f32 %v2182_v63, %v1099_v57  ;;  %v1090_v23 = vmul.f32 %v2177_v2, %v1012_v3  ;;  %v1098_v51 = vmul.f32 %v2177_v2, %v1052_v4 }
 0x1fb   : > { %v1130_v56 = vmax.f32 %v1114_v22, 0.0  ;;  %v1138_v59 = vmax.f32 %v1122_v12, 0.0  ;;  %v1113_v60 = vadd.f32 %v2182_v63, %v1090_v23  ;;  %v1121_v24 = vadd.f32 %v2182_v63, %v1098_v51 }
 0x1fd   : > { %1146 = vst [vmem:[%s2194_s12 + $0x18] sm:$0xff] %v1130_v56  ;;  %1154 = vst [vmem:[%s2194_s12 + $0x58] sm:$0xff] %v1138_v59  ;;  %v1129_v20 = vmax.f32 %v1113_v60, 0.0  ;;  %v1137_v58 = vmax.f32 %v1121_v24, 0.0 }
 0x1ff   : > { %1145 = vst [vmem:[%s2194_s12 + $0x10] sm:$0xff] %v1129_v20  ;;  %1153 = vst [vmem:[%s2194_s12 + $0x50] sm:$0xff] %v1137_v58 }
 0x232   : > { %v1317_v15 = vpop.f32.mrf.mxu1 }
 0x233   : > { %v1305_v18 = vpop.f32.mrf.mxu0  ;;  %v1101_v26 = vmul.f32 %v1317_v15, %v2177_v2 }
 0x234   : > { %v1093_v13 = vmul.f32 %v1305_v18, %v2177_v2  ;;  %v1062_v14 = vpop.f32.mrf.mxu1 }
 0x235   : > { %v1124_v27 = vadd.f32 %v2182_v63, %v1101_v26  ;;  %v1022_v31 = vpop.f32.mrf.mxu0  ;;  %v1100_v54 = vmul.f32 %v2177_v2, %v1062_v14 }
 0x236   : > { %v1116_v32 = vadd.f32 %v2182_v63, %v1093_v13  ;;  %v1092_v25 = vmul.f32 %v2177_v2, %v1022_v31 }
 0x237   : > { %v1140_v8 = vmax.f32 %v1124_v27, 0.0  ;;  %v1123_v43 = vadd.f32 %v2182_v63, %v1100_v54 }
 0x238   : > { %v1132_v28 = vmax.f32 %v1116_v32, 0.0  ;;  %v1115_v45 = vadd.f32 %v2182_v63, %v1092_v25 }
 0x239   : > { %1156 = vst [vmem:[%s2194_s12 + $0x68] sm:$0xff] %v1140_v8  ;;  %v1139_v17 = vmax.f32 %v1123_v43, 0.0 }
 0x23a   : > { %1148 = vst [vmem:[%s2194_s12 + $0x28] sm:$0xff] %v1132_v28  ;;  %v1131_v9 = vmax.f32 %v1115_v45, 0.0 }
 0x23b   : > { %1155 = vst [vmem:[%s2194_s12 + $0x60] sm:$0xff] %v1139_v17 }
 0x23c   : > { %1147 = vst [vmem:[%s2194_s12 + $0x20] sm:$0xff] %v1131_v9 }
 0x24e   : > { %v1320_v29 = vpop.f32.mrf.mxu1 }
 0x24f   : > { %v1308_v46 = vpop.f32.mrf.mxu0  ;;  %v1103_v40 = vmul.f32 %v1320_v29, %v2177_v2 }
 0x250   : > { %v1095_v30 = vmul.f32 %v1308_v46, %v2177_v2  ;;  %v1072_v41 = vpop.f32.mrf.mxu1 }
 0x251   : > { %v1126_v0 = vadd.f32 %v2182_v63, %v1103_v40  ;;  %v1032_v44 = vpop.f32.mrf.mxu0  ;;  %v1102_v33 = vmul.f32 %v2177_v2, %v1072_v41 }
 0x252   : > { %v1118_v48 = vadd.f32 %v2182_v63, %v1095_v30  ;;  %v1094_v49 = vmul.f32 %v2177_v2, %v1032_v44 }
 0x253   : > { %v1142_v42 = vmax.f32 %v1126_v0, 0.0  ;;  %v1125_v47 = vadd.f32 %v2182_v63, %v1102_v33 }
 0x254   : > { %v1134_v61 = vmax.f32 %v1118_v48, 0.0  ;;  %v1117_v62 = vadd.f32 %v2182_v63, %v1094_v49 }
 0x255   : > { %1158 = vst [vmem:[%s2194_s12 + $0x78] sm:$0xff] %v1142_v42  ;;  %v1141_v10 = vmax.f32 %v1125_v47, 0.0 }
 0x256   : > { %1150 = vst [vmem:[%s2194_s12 + $0x38] sm:$0xff] %v1134_v61  ;;  %v1133_v1 = vmax.f32 %v1117_v62, 0.0 }
 0x257   : > { %1157 = vst [vmem:[%s2194_s12 + $0x70] sm:$0xff] %v1141_v10 }
 0x258   : > { %1149 = vst [vmem:[%s2194_s12 + $0x30] sm:$0xff] %v1133_v1 }
 0x259   : > { %1393 = shalt.err (!%p1390_p3)
}
 0x25a   : > { %s1394_s5 = scalar_lea.hbm %s2238_s28, 2048  ;;  %s1398_s9 = scalar_lea.hbm %s2292_s4, 8192 }
 0x25b   : > { %p1395_p4 = scmp.ne.s32.totalorder %s2238_s28, %s1394_s5  ;;  %p1399_p9 = scmp.lt.s32.totalorder %s2238_s28, %s2292_s4 }
 0x25c   : > { %p1400_p10 = scmp.lt.s32.totalorder %s1398_s9, %s1394_s5 }
 0x25d   : > { %p1396_p7 = pnand %p1395_p4, %p1515_p5 }
 0x25e   : > { %p1401_p11 = por %p1400_p10, %p1399_p9 }
 0x25f   : > { %p1397_p8 = pneg %p1396_p7 }
 0x261   : > { %p1402_p12 = pnand %p1401_p11, %p1397_p8 }
 0x263   : > { %1405 = shalt.err (!%p1402_p12)
}
 0x264   : > { %s1451_s12 = smov 128  }
 0x265   : > { %1332 = dma.vmem_to_hbm [thread:$0]  (%p1515_p5), %s2241_s22, 2048, %s2238_s28, %s2247_s19, %s1451_s12, %s1451_s12, %s1443_s7  }
 0x266 PF: > { %p1338_p13 = scmp.ge.s32.totalorder %s1440_s18, 2  ;;  %s1188_s20 = sand.u32 1, %s1428_s15  }
 0x267   : > { %s1189_s23 = scalar_lea.sflag [#allocation3], %s1188_s20 }
 0x268   : > { %p1335_p0 = pnand %p1338_p13, %p1519_p6 }
 0x26a   : > { %p1336_p1 = pneg %p1335_p0 }
 0x26c   : > { %1423 = dma.done.wait (%p1336_p1), %s1189_s23, 2048  }
 0x26d   : > { %1425 = vsyncadd (%p1336_p1), %s1189_s23, 4294965248  ;;  %p14_p2 = scmp.ge.s32.totalorder %s1502_s21, 6   ;;  %s2322_s15 = smov %s1432_s16 }
 0x26e   : > { %s2323_s16 = smov %s1436_s17  ;;  %s2324_s17 = smov %s1513_s24 }
 0x26f   : > { %s2325_s18 = smov %s1502_s21  ;;  %16 = sbr.rel (!%p14_p2) target bundleno = 3 (0x3), region = 71 }
 0x274   :  { %1194 = vsyncpa [#allocation3], 1 }
 0x275   :  { %1196 = vsyncpa [#allocation3 + $0x1], 1 }

</bundles_post_ra>
